<compile_context>
chip_gen: v5e
topology: v5e:2x2
jax: 0.10.0
libtpu: 0.0.40
codegen_flags: <defaults>
</compile_context>

<pallas_src>
import jax
import jax.numpy as jnp
from jax.experimental import pallas as pl
from jax.experimental.pallas import tpu as pltpu


_LANE = 1024      # last-dim tile width: multiple of 128, lane-dense
_ROW_TILE = 512   # sublane tile: 512 * 1024 * 4 B = 2 MiB per f32 block


def _triple_linear_kernel(w_ref, b_ref, x_ref, o_ref):
    # w_ref/b_ref are (1, 1) f32 scalars in SMEM; x_ref/o_ref are lane-dense
    # VMEM tiles. Fold fc(fc(fc(x))) into a single affine per element:
    #   y = x * w^3 + b * (w^2 + w + 1)
    # Scalar math stays in-kernel so it rides along with the HBM-bound
    # elementwise stream for free (2 VALU ops/elem instead of 6).
    w = w_ref[0, 0]
    b = b_ref[0, 0]
    w2 = w * w
    w3 = w2 * w
    beff = b * (w2 + w + 1.0)
    o_ref[...] = (x_ref[...].astype(jnp.float32) * w3 + beff).astype(o_ref.dtype)


def _triple_linear_pallas(x, w, b):
    orig_shape = x.shape
    orig_dtype = x.dtype
    total = x.size

    flat = x.reshape(-1)

    # Lane-dense repack: view the data as a (rows, _LANE) slab so every vreg
    # carries 1024 useful elements instead of 8 and stores are unmasked vst.
    rows = pl.cdiv(total, _LANE)
    if rows >= _ROW_TILE:
        tr = _ROW_TILE
    else:
        tr = max(8, pl.cdiv(rows, 8) * 8)          # keep sublane dim % 8 == 0
    rows_padded = pl.cdiv(rows, tr) * tr
    padded_total = rows_padded * _LANE
    if padded_total != total:
        flat = jnp.pad(flat, (0, padded_total - total))
    x2d = flat.reshape(rows_padded, _LANE)

    w2d = jnp.asarray(w, jnp.float32).reshape(1, 1)
    b2d = jnp.asarray(b, jnp.float32).reshape(1, 1)

    num_blocks = rows_padded // tr

    out2d = pl.pallas_call(
        _triple_linear_kernel,
        out_shape=jax.ShapeDtypeStruct((rows_padded, _LANE), orig_dtype),
        grid=(num_blocks,),
        in_specs=[
            pl.BlockSpec(memory_space=pltpu.MemorySpace.SMEM),   # w scalar
            pl.BlockSpec(memory_space=pltpu.MemorySpace.SMEM),   # b scalar
            pl.BlockSpec((tr, _LANE), lambda i: (i, 0)),          # x tile
        ],
        out_specs=pl.BlockSpec((tr, _LANE), lambda i: (i, 0)),
        compiler_params=pltpu.CompilerParams(
            dimension_semantics=("parallel",),   # megacore sharding on v7x
        ),
    )(w2d, b2d, x2d)

    return out2d.reshape(-1)[:total].reshape(orig_shape)


def triple_linear(x, w, b, *, min_pallas_elems=4096):
    """fc(fc(fc(x))) for fc = nn.Linear(1, 1), weight w (1,1), bias b (1,).

    Small inputs take a fused XLA fast path (kernel dispatch overhead would
    dominate); larger inputs stream through the tiled Pallas kernel.
    """
    if x.size < min_pallas_elems:
        wf = jnp.asarray(w, jnp.float32).reshape(())
        bf = jnp.asarray(b, jnp.float32).reshape(())
        w2 = wf * wf
        return (x.astype(jnp.float32) * (w2 * wf)
                + bf * (w2 + wf + 1.0)).astype(x.dtype)
    return _triple_linear_pallas(x, w, b)


if __name__ == "__main__":
    key = jax.random.PRNGKey(0)
    kx, kw, kb, kx2 = jax.random.split(key, 4)

    # nn.Linear(1, 1) parameters: weight (1, 1), bias (1,). PyTorch default
    # init is U(-1/sqrt(fan_in), 1/sqrt(fan_in)) with fan_in = 1.
    w = jax.random.uniform(kw, (1, 1), jnp.float32, minval=-1.0, maxval=1.0)
    b = jax.random.uniform(kb, (1,), jnp.float32, minval=-1.0, maxval=1.0)

    def fc(v):
        return v @ w.T + b

    def ref(v):
        return fc(fc(fc(v)))

    # Small input consistent with Linear(1, 1): batch=8, features=1.
    x_small = jax.random.normal(kx, (8, 1), jnp.float32)

    # Force the Pallas path once even at the tiny demo size.
    out_small = jax.block_until_ready(
        triple_linear(x_small, w, b, min_pallas_elems=0))
    assert out_small.shape == x_small.shape, (out_small.shape, x_small.shape)
    assert jnp.allclose(out_small, ref(x_small), rtol=1e-5, atol=1e-5)

    # Default dispatch: tiny-input fast path.
    out_fast = jax.block_until_ready(triple_linear(x_small, w, b))
    assert jnp.allclose(out_fast, ref(x_small), rtol=1e-5, atol=1e-5)

    # Moderately sized input: exercises padding + multi-block grid (grid > 1).
    n_big = _ROW_TILE * _LANE + 1000
    x_big = jax.random.normal(kx2, (n_big, 1), jnp.float32)
    out_big = jax.block_until_ready(triple_linear(x_big, w, b))
    assert out_big.shape == x_big.shape, (out_big.shape, x_big.shape)
    assert jnp.allclose(out_big, ref(x_big), rtol=1e-5, atol=1e-5)

    print("KERNEL_OK")
</pallas_src>

<mosaic_0001>
module attributes {stable_mosaic.version = 11 : i64} {
  func.func @_triple_linear_kernel(%arg0: i32, %arg1: memref<1x1xf32, #tpu.memory_space<smem>>, %arg2: memref<1x1xf32, #tpu.memory_space<smem>>, %arg3: memref<8x1024xf32, #tpu.memory_space<vmem>>, %arg4: memref<8x1024xf32, #tpu.memory_space<vmem>>) attributes {dimension_semantics = [#tpu.dimension_semantics<parallel>], iteration_bounds = array<i64: 1>, scalar_prefetch = 0 : i64, scratch_operands = 0 : i64, tpu.core_type = #tpu.core_type<tc>, window_params = [{transform_indices = @transform_0, window_bounds = array<i64: 1, 1>}, {transform_indices = @transform_1, window_bounds = array<i64: 1, 1>}, {transform_indices = @transform_2, window_bounds = array<i64: 8, 1024>}, {transform_indices = @transform_3, window_bounds = array<i64: 8, 1024>}]} {
    %c0 = arith.constant 0 : index
    %c0_0 = arith.constant 0 : index
    %0 = memref.load %arg1[%c0, %c0_0] : memref<1x1xf32, #tpu.memory_space<smem>>
    %c0_1 = arith.constant 0 : index
    %c0_2 = arith.constant 0 : index
    %1 = memref.load %arg2[%c0_1, %c0_2] : memref<1x1xf32, #tpu.memory_space<smem>>
    %2 = arith.mulf %0, %0 : f32
    %3 = arith.mulf %2, %0 : f32
    %4 = arith.addf %2, %0 : f32
    %cst = arith.constant 1.000000e+00 : f32
    %5 = arith.addf %4, %cst : f32
    %6 = arith.mulf %1, %5 : f32
    %c0_3 = arith.constant 0 : index
    %c0_4 = arith.constant 0 : index
    %7 = vector.load %arg3[%c0_3, %c0_4] : memref<8x1024xf32, #tpu.memory_space<vmem>>, vector<8x1024xf32>
    %8 = vector.broadcast %3 : f32 to vector<8x1024xf32>
    %9 = arith.mulf %7, %8 : vector<8x1024xf32>
    %10 = vector.broadcast %6 : f32 to vector<8x1024xf32>
    %11 = arith.addf %9, %10 : vector<8x1024xf32>
    %c0_5 = arith.constant 0 : index
    %c0_6 = arith.constant 0 : index
    %12 = vector.load %arg4[%c0_5, %c0_6] : memref<8x1024xf32, #tpu.memory_space<vmem>>, vector<8x1024xf32>
    tpu.vector_store %arg4[%c0_5, %c0_6], %11 {strides = array<i32>} : memref<8x1024xf32, #tpu.memory_space<vmem>>, vector<8x1024xf32>,
    return
  }
  func.func @transform_0(%arg0: i32) -> (i32, i32) {
    %c0_i32 = arith.constant 0 : i32
    %c0_i32_0 = arith.constant 0 : i32
    %c0_i32_1 = arith.constant 0 : i32
    return %c0_i32, %c0_i32_0 : i32, i32
  }
  func.func @transform_1(%arg0: i32) -> (i32, i32) {
    %c0_i32 = arith.constant 0 : i32
    %c0_i32_0 = arith.constant 0 : i32
    %c0_i32_1 = arith.constant 0 : i32
    return %c0_i32, %c0_i32_0 : i32, i32
  }
  func.func @transform_2(%arg0: i32) -> (i32, i32) {
    %c0_i32 = arith.constant 0 : i32
    %c0_i32_0 = arith.constant 0 : i32
    return %arg0, %c0_i32 : i32, i32
  }
  func.func @transform_3(%arg0: i32) -> (i32, i32) {
    %c0_i32 = arith.constant 0 : i32
    %c0_i32_0 = arith.constant 0 : i32
    return %arg0, %c0_i32 : i32, i32
  }
}

</mosaic_0001>

<bundles_post_ra>
// kernel: tpu_custom_call.1
= control target key start
LH: loop header
LB: loop body
LE: loop exit
PB: predicated region body
PF: predicated region fallthrough
CT: control target
= control target key end

     0   :  { %10 = vsyncpa [#allocation5], 0  ;;  %s184_s0 = inlined_call_operand.<no memory space> [shape: f32[1,1], index: 0, kind: input, shape index: {}]   ;;  %s185_s1 = inlined_call_operand.<no memory space> [shape: f32[1,1], index: 1, kind: input, shape index: {}]   ;;  %s186_s2 = inlined_call_operand.hbm [shape: f32[8,1024], index: 2, kind: input, shape index: {}]   ;;  %s187_s3 = inlined_call_operand.hbm [shape: f32[8,1024], index: 3, kind: output, shape index: {}]  }
   0x1   :  { %11 = vsyncpa [#allocation6], 0  ;;  %s21_s14 = sshll.u32 %s186_s2, 4  ;;  %s143_s15 = smov [#allocation4]   ;;  %s22_s14 = int_to_ptr.hbm [resolvable:$true] %s21_s14 }
   0x2   :  { %s23_s16 = sshll.u32 %s143_s15, 4  ;;  %s24_s16 = int_to_ptr.vmem [resolvable:$true] %s23_s16 }
   0x3   :  { %26 = dma.hbm_to_vmem [thread:$0]  %s22_s14, 1024, %s24_s16, [#allocation5]  }
   0x4   :  { %139 = dma.done.wait [#allocation5], 1024  }
   0x5   :  { %140 = vsyncadd [#allocation5], 4294966272  ;;  %s33_s19 = smul.f32 %s184_s0, %s184_s0  ;;  %v38_v1 = vld [vmem:[#allocation4] sm:$0xff]  ;;  %v39_v2 = vld [vmem:[#allocation4 + $0x8] sm:$0xff]  ;;  %s79_s4 = sshll.u32 %s187_s3, 4  ;;  %s80_s4 = int_to_ptr.hbm [resolvable:$true] %s79_s4 }
   0x6   :  { %v40_v3 = vld [vmem:[#allocation4 + $0x10] sm:$0xff]  ;;  %v41_v8 = vld [vmem:[#allocation4 + $0x18] sm:$0xff]  ;;  %v42_v9 = vld [vmem:[#allocation4 + $0x20] sm:$0xff] }
   0x7   :  { %s34_s22 = smul.f32 %s33_s19, %s184_s0  ;;  %s35_s2 = sadd.f32 %s33_s19, %s184_s0  ;;  %v43_v10 = vld [vmem:[#allocation4 + $0x28] sm:$0xff]  ;;  %v44_v14 = vld [vmem:[#allocation4 + $0x30] sm:$0xff]  ;;  %v45_v15 = vld [vmem:[#allocation4 + $0x38] sm:$0xff] }
   0x8   :  { %s144_s0 = smov [#allocation7]  }
   0x9   :  { %s36_s25 = sadd.f32 1.0, %s35_s2  ;;  %v46_v0 = vstv %s34_s22 }
   0xa   :  { %v47_v4 = vmul.f32 %v46_v0, %v38_v1  ;;  %v48_v6 = vmul.f32 %v46_v0, %v39_v2  ;;  %v49_v7 = vmul.f32 %v46_v0, %v40_v3  ;;  %v50_v11 = vmul.f32 %v46_v0, %v41_v8 }
   0xb   :  { %s37_s28 = smul.f32 %s36_s25, %s185_s1  ;;  %v51_v12 = vmul.f32 %v46_v0, %v42_v9  ;;  %v52_v13 = vmul.f32 %v46_v0, %v43_v10  ;;  %v53_v19 = vmul.f32 %v46_v0, %v44_v14  ;;  %v54_v21 = vmul.f32 %v46_v0, %v45_v15  ;;  %s77_s1 = sshll.u32 %s144_s0, 4  ;;  %s78_s1 = int_to_ptr.vmem [resolvable:$true] %s77_s1 }
   0xd   :  { %v55_v5 = vstv %s37_s28 }
   0xe   :  { %v56_v16 = vadd.f32 %v55_v5, %v47_v4  ;;  %v57_v17 = vadd.f32 %v55_v5, %v48_v6  ;;  %v58_v18 = vadd.f32 %v55_v5, %v49_v7  ;;  %v59_v20 = vadd.f32 %v55_v5, %v50_v11 }
   0xf   :  { %v60_v22 = vadd.f32 %v55_v5, %v51_v12  ;;  %v61_v23 = vadd.f32 %v55_v5, %v52_v13  ;;  %v62_v24 = vadd.f32 %v55_v5, %v53_v19  ;;  %v63_v25 = vadd.f32 %v55_v5, %v54_v21 }
  0x10   :  { %64 = vst [vmem:[#allocation7] sm:$0xff] %v56_v16 }
  0x11   :  { %65 = vst [vmem:[#allocation7 + $0x8] sm:$0xff] %v57_v17 }
  0x12   :  { %66 = vst [vmem:[#allocation7 + $0x10] sm:$0xff] %v58_v18 }
  0x13   :  { %67 = vst [vmem:[#allocation7 + $0x18] sm:$0xff] %v59_v20 }
  0x14   :  { %68 = vst [vmem:[#allocation7 + $0x20] sm:$0xff] %v60_v22 }
  0x15   :  { %69 = vst [vmem:[#allocation7 + $0x28] sm:$0xff] %v61_v23 }
  0x16   :  { %70 = vst [vmem:[#allocation7 + $0x30] sm:$0xff] %v62_v24 }
  0x17   :  { %71 = vst [vmem:[#allocation7 + $0x38] sm:$0xff] %v63_v25 }
  0x18   :  { %82 = dma.vmem_to_hbm [thread:$0]  %s78_s1, 1024, %s80_s4, [#allocation6]  }
  0x19   :  { %141 = dma.done.wait [#allocation6], 1024  }
  0x1a   :  { %142 = vsyncadd [#allocation6], 4294966272 }
  0x1b   :  { %87 = vsyncpa [#allocation5], 1 }
  0x1c   :  { %88 = vsyncpa [#allocation6], 1 }

</bundles_post_ra>
